<compile_context>
chip_gen: v7x
topology: tpu7x:2x2x1
jax: 0.10.0
libtpu: 0.0.40
codegen_flags: <defaults>
</compile_context>

<pallas_src>
import jax
import jax.numpy as jnp
from jax.experimental import pallas as pl
from jax.experimental.pallas import tpu as pltpu

LANE = 128
SUBLANE = 8
NEG_INF = -1e30  # padded-class logit; exp underflows to exactly 0 in f32


def _round_up(x, m):
    return ((x + m - 1) // m) * m


def actor_softmax_kernel(x_ref, w1_ref, b1_ref, w2_ref, b2_ref, w3_ref, b3_ref, out_ref):
    x = x_ref[...]                                            # (TB, D_in_pad) f32

    # fc1 + ReLU
    h1 = jnp.dot(x, w1_ref[...], preferred_element_type=jnp.float32) + b1_ref[...]
    h1 = jnp.maximum(h1, 0.0)

    # fc2 + ReLU
    h2 = jnp.dot(h1, w2_ref[...], preferred_element_type=jnp.float32) + b2_ref[...]
    h2 = jnp.maximum(h2, 0.0)

    # fc3 logits (padded classes carry NEG_INF bias -> exp == 0)
    logits = jnp.dot(h2, w3_ref[...], preferred_element_type=jnp.float32) + b3_ref[...]

    # numerically-stable softmax over axis=1 (class axis); divide routed to the EUP.
    m = jnp.max(logits, axis=1, keepdims=True)
    e = jnp.exp(logits - m)
    denom = jnp.sum(e, axis=1, keepdims=True)
    out_ref[...] = e * pl.reciprocal(denom, approx=False)


def actor_softmax_forward(x, w1, b1, w2, b2, w3, b3, *, block_batch=512):
    batch, input_dim = x.shape
    hidden1 = w1.shape[1]
    hidden2 = w2.shape[1]
    output_dim = w3.shape[1]

    # Lane-dense padded feature sizes.
    d_in = _round_up(input_dim, LANE)
    d_h1 = _round_up(hidden1, LANE)
    d_h2 = _round_up(hidden2, LANE)
    d_out = _round_up(output_dim, LANE)

    # Batch tile: multiple of 8 sublanes, capped at block_batch rows.
    tb = min(block_batch, _round_up(batch, SUBLANE))
    b_pad = _round_up(batch, tb)

    f32 = jnp.float32
    # Zero-pad activations/weights; padded input/hidden units contribute exactly 0.
    xp = jnp.zeros((b_pad, d_in), f32).at[:batch, :input_dim].set(x)
    w1p = jnp.zeros((d_in, d_h1), f32).at[:input_dim, :hidden1].set(w1)
    b1p = jnp.zeros((1, d_h1), f32).at[:, :hidden1].set(b1)
    w2p = jnp.zeros((d_h1, d_h2), f32).at[:hidden1, :hidden2].set(w2)
    b2p = jnp.zeros((1, d_h2), f32).at[:, :hidden2].set(b2)
    w3p = jnp.zeros((d_h2, d_out), f32).at[:hidden2, :output_dim].set(w3)
    # Padded classes get NEG_INF bias so softmax assigns them zero probability.
    b3p = jnp.full((1, d_out), NEG_INF, f32).at[:, :output_dim].set(b3)

    grid = (b_pad // tb,)

    def batch_spec(feat):
        return pl.BlockSpec((tb, feat), lambda i: (i, 0))

    def const_spec(shape):
        return pl.BlockSpec(shape, lambda i: (0, 0))

    flops = 2 * b_pad * (d_in * d_h1 + d_h1 * d_h2 + d_h2 * d_out)
    bytes_accessed = 4 * (xp.size + w1p.size + b1p.size + w2p.size + b2p.size
                          + w3p.size + b3p.size + b_pad * d_out)
    cost = pl.CostEstimate(flops=flops,
                           transcendentals=b_pad * d_out,
                           bytes_accessed=bytes_accessed)

    out_padded = pl.pallas_call(
        actor_softmax_kernel,
        out_shape=jax.ShapeDtypeStruct((b_pad, d_out), f32),
        grid=grid,
        in_specs=[
            batch_spec(d_in),                  # x: tiled over batch
            const_spec((d_in, d_h1)),          # w1: VMEM-resident across grid steps
            const_spec((1, d_h1)),             # b1
            const_spec((d_h1, d_h2)),          # w2
            const_spec((1, d_h2)),             # b2
            const_spec((d_h2, d_out)),         # w3
            const_spec((1, d_out)),            # b3
        ],
        out_specs=batch_spec(d_out),
        compiler_params=pltpu.CompilerParams(
            dimension_semantics=("parallel",),     # megacore-shard the batch grid
            vmem_limit_bytes=32 * 1024 * 1024,     # raise v5e's 16 MiB scoped default
        ),
        cost_estimate=cost,
    )(xp, w1p, b1p, w2p, b2p, w3p, b3p)

    # Strip batch/class padding.
    return out_padded[:batch, :output_dim]


def init_linear(key, fan_in, fan_out):
    """Deterministic init mimicking nn.Linear's U(-1/sqrt(fan_in), 1/sqrt(fan_in))."""
    kw, kb = jax.random.split(key)
    bound = 1.0 / jnp.sqrt(fan_in)
    # stored as (in_features, out_features) so kernel does x @ W
    w = jax.random.uniform(kw, (fan_in, fan_out), jnp.float32, -bound, bound)
    b = jax.random.uniform(kb, (1, fan_out), jnp.float32, -bound, bound)
    return w, b


if __name__ == "__main__":
    # Small shapes consistent with the module (hidden_dim defaults to 256 in the spec).
    batch, input_dim, hidden_dim, output_dim = 8, 16, 256, 4

    key = jax.random.PRNGKey(0)
    kx, k1, k2, k3 = jax.random.split(key, 4)

    x = jax.random.normal(kx, (batch, input_dim), jnp.float32)
    w1, b1 = init_linear(k1, input_dim, hidden_dim)
    w2, b2 = init_linear(k2, hidden_dim, hidden_dim)
    w3, b3 = init_linear(k3, hidden_dim, output_dim)

    probs = actor_softmax_forward(x, w1, b1, w2, b2, w3, b3)
    probs = jax.block_until_ready(probs)

    # reference check in plain JAX (unpadded f32 math)
    h1 = jnp.maximum(x @ w1 + b1, 0.0)
    h2 = jnp.maximum(h1 @ w2 + b2, 0.0)
    ref = jax.nn.softmax(h2 @ w3 + b3, axis=1)
    assert probs.shape == (batch, output_dim)
    assert jnp.allclose(probs, ref, atol=1e-5), "mismatch vs reference"
    assert jnp.allclose(jnp.sum(probs, axis=1), 1.0, atol=1e-5)

    print("KERNEL_OK")
</pallas_src>

<mosaic_0001>
module attributes {stable_mosaic.version = 11 : i64} {
  func.func @actor_softmax_kernel(%arg0: i32, %arg1: memref<8x128xf32, #tpu.memory_space<vmem>>, %arg2: memref<128x256xf32, #tpu.memory_space<vmem>>, %arg3: memref<1x256xf32, #tpu.memory_space<vmem>>, %arg4: memref<256x256xf32, #tpu.memory_space<vmem>>, %arg5: memref<1x256xf32, #tpu.memory_space<vmem>>, %arg6: memref<256x128xf32, #tpu.memory_space<vmem>>, %arg7: memref<1x128xf32, #tpu.memory_space<vmem>>, %arg8: memref<8x128xf32, #tpu.memory_space<vmem>>) attributes {dimension_semantics = [#tpu.dimension_semantics<parallel>], iteration_bounds = array<i64: 1>, scalar_prefetch = 0 : i64, scratch_operands = 0 : i64, tpu.core_type = #tpu.core_type<tc>, window_params = [{transform_indices = @transform_0, window_bounds = array<i64: 8, 128>}, {pipeline_mode = #tpu.pipeline_mode<synchronous>, transform_indices = @transform_1, window_bounds = array<i64: 128, 256>}, {pipeline_mode = #tpu.pipeline_mode<synchronous>, transform_indices = @transform_2, window_bounds = array<i64: 1, 256>}, {pipeline_mode = #tpu.pipeline_mode<synchronous>, transform_indices = @transform_3, window_bounds = array<i64: 256, 256>}, {pipeline_mode = #tpu.pipeline_mode<synchronous>, transform_indices = @transform_4, window_bounds = array<i64: 1, 256>}, {pipeline_mode = #tpu.pipeline_mode<synchronous>, transform_indices = @transform_5, window_bounds = array<i64: 256, 128>}, {pipeline_mode = #tpu.pipeline_mode<synchronous>, transform_indices = @transform_6, window_bounds = array<i64: 1, 128>}, {transform_indices = @transform_7, window_bounds = array<i64: 8, 128>}]} {
    %c0 = arith.constant 0 : index
    %c0_0 = arith.constant 0 : index
    %0 = vector.load %arg1[%c0, %c0_0] : memref<8x128xf32, #tpu.memory_space<vmem>>, vector<8x128xf32>
    %c0_1 = arith.constant 0 : index
    %c0_2 = arith.constant 0 : index
    %1 = vector.load %arg2[%c0_1, %c0_2] : memref<128x256xf32, #tpu.memory_space<vmem>>, vector<128x256xf32>
    %cst = arith.constant dense<0.000000e+00> : vector<8x256xf32>
    %2 = tpu.matmul %0, %1, %cst {dimension_numbers = #tpu.dot_dimension_numbers<[1], [0], [0], [1], [0, 0, 1, 1], [], []>} : vector<8x128xf32>, vector<128x256xf32>, vector<8x256xf32> -> vector<8x256xf32>
    %c0_3 = arith.constant 0 : index
    %c0_4 = arith.constant 0 : index
    %3 = vector.load %arg3[%c0_3, %c0_4] : memref<1x256xf32, #tpu.memory_space<vmem>>, vector<1x256xf32>
    %4 = vector.broadcast %3 : vector<1x256xf32> to vector<8x256xf32>
    %5 = arith.addf %2, %4 : vector<8x256xf32>
    %cst_5 = arith.constant 0.000000e+00 : f32
    %6 = vector.broadcast %cst_5 : f32 to vector<8x256xf32>
    %7 = arith.maximumf %5, %6 : vector<8x256xf32>
    %c0_6 = arith.constant 0 : index
    %c0_7 = arith.constant 0 : index
    %8 = vector.load %arg4[%c0_6, %c0_7] : memref<256x256xf32, #tpu.memory_space<vmem>>, vector<256x256xf32>
    %cst_8 = arith.constant dense<0.000000e+00> : vector<8x256xf32>
    %9 = tpu.matmul %7, %8, %cst_8 {dimension_numbers = #tpu.dot_dimension_numbers<[1], [0], [0], [1], [0, 0, 1, 1], [], []>} : vector<8x256xf32>, vector<256x256xf32>, vector<8x256xf32> -> vector<8x256xf32>
    %c0_9 = arith.constant 0 : index
    %c0_10 = arith.constant 0 : index
    %10 = vector.load %arg5[%c0_9, %c0_10] : memref<1x256xf32, #tpu.memory_space<vmem>>, vector<1x256xf32>
    %11 = vector.broadcast %10 : vector<1x256xf32> to vector<8x256xf32>
    %12 = arith.addf %9, %11 : vector<8x256xf32>
    %cst_11 = arith.constant 0.000000e+00 : f32
    %13 = vector.broadcast %cst_11 : f32 to vector<8x256xf32>
    %14 = arith.maximumf %12, %13 : vector<8x256xf32>
    %c0_12 = arith.constant 0 : index
    %c0_13 = arith.constant 0 : index
    %15 = vector.load %arg6[%c0_12, %c0_13] : memref<256x128xf32, #tpu.memory_space<vmem>>, vector<256x128xf32>
    %cst_14 = arith.constant dense<0.000000e+00> : vector<8x128xf32>
    %16 = tpu.matmul %14, %15, %cst_14 {dimension_numbers = #tpu.dot_dimension_numbers<[1], [0], [0], [1], [0, 0, 1, 1], [], []>} : vector<8x256xf32>, vector<256x128xf32>, vector<8x128xf32> -> vector<8x128xf32>
    %c0_15 = arith.constant 0 : index
    %c0_16 = arith.constant 0 : index
    %17 = vector.load %arg7[%c0_15, %c0_16] : memref<1x128xf32, #tpu.memory_space<vmem>>, vector<1x128xf32>
    %18 = vector.broadcast %17 : vector<1x128xf32> to vector<8x128xf32>
    %19 = arith.addf %16, %18 : vector<8x128xf32>
    %cst_17 = arith.constant dense<0xFF800000> : vector<8xf32>
    %20 = vector.multi_reduction <maximumf>, %19, %cst_17 [1] : vector<8x128xf32> to vector<8xf32>
    %21 = vector.shape_cast %20 : vector<8xf32> to vector<8x1xf32>
    %22 = vector.broadcast %21 : vector<8x1xf32> to vector<8x128xf32>
    %23 = arith.subf %19, %22 : vector<8x128xf32>
    %24 = math.exp %23 : vector<8x128xf32>
    %cst_18 = arith.constant dense<0.000000e+00> : vector<8xf32>
    %25 = vector.multi_reduction <add>, %24, %cst_18 [1] : vector<8x128xf32> to vector<8xf32>
    %26 = vector.shape_cast %25 : vector<8xf32> to vector<8x1xf32>
    %27 = tpu.reciprocal %26 : vector<8x1xf32> -> vector<8x1xf32>
    %28 = vector.broadcast %27 : vector<8x1xf32> to vector<8x128xf32>
    %29 = arith.mulf %24, %28 : vector<8x128xf32>
    %c0_19 = arith.constant 0 : index
    %c0_20 = arith.constant 0 : index
    %30 = vector.load %arg8[%c0_19, %c0_20] : memref<8x128xf32, #tpu.memory_space<vmem>>, vector<8x128xf32>
    tpu.vector_store %arg8[%c0_19, %c0_20], %29 {strides = array<i32>} : memref<8x128xf32, #tpu.memory_space<vmem>>, vector<8x128xf32>,
    return
  }
  func.func @transform_0(%arg0: i32) -> (i32, i32) {
    %c0_i32 = arith.constant 0 : i32
    %c0_i32_0 = arith.constant 0 : i32
    return %arg0, %c0_i32 : i32, i32
  }
  func.func @transform_1(%arg0: i32) -> (i32, i32) {
    %c0_i32 = arith.constant 0 : i32
    %c0_i32_0 = arith.constant 0 : i32
    %c0_i32_1 = arith.constant 0 : i32
    return %c0_i32, %c0_i32_0 : i32, i32
  }
  func.func @transform_2(%arg0: i32) -> (i32, i32) {
    %c0_i32 = arith.constant 0 : i32
    %c0_i32_0 = arith.constant 0 : i32
    %c0_i32_1 = arith.constant 0 : i32
    return %c0_i32, %c0_i32_0 : i32, i32
  }
  func.func @transform_3(%arg0: i32) -> (i32, i32) {
    %c0_i32 = arith.constant 0 : i32
    %c0_i32_0 = arith.constant 0 : i32
    %c0_i32_1 = arith.constant 0 : i32
    return %c0_i32, %c0_i32_0 : i32, i32
  }
  func.func @transform_4(%arg0: i32) -> (i32, i32) {
    %c0_i32 = arith.constant 0 : i32
    %c0_i32_0 = arith.constant 0 : i32
    %c0_i32_1 = arith.constant 0 : i32
    return %c0_i32, %c0_i32_0 : i32, i32
  }
  func.func @transform_5(%arg0: i32) -> (i32, i32) {
    %c0_i32 = arith.constant 0 : i32
    %c0_i32_0 = arith.constant 0 : i32
    %c0_i32_1 = arith.constant 0 : i32
    return %c0_i32, %c0_i32_0 : i32, i32
  }
  func.func @transform_6(%arg0: i32) -> (i32, i32) {
    %c0_i32 = arith.constant 0 : i32
    %c0_i32_0 = arith.constant 0 : i32
    %c0_i32_1 = arith.constant 0 : i32
    return %c0_i32, %c0_i32_0 : i32, i32
  }
  func.func @transform_7(%arg0: i32) -> (i32, i32) {
    %c0_i32 = arith.constant 0 : i32
    %c0_i32_0 = arith.constant 0 : i32
    return %arg0, %c0_i32 : i32, i32
  }
}

</mosaic_0001>

<bundles_post_ra>
// kernel: tpu_custom_call.1
= control target key start
LH: loop header
LB: loop body
LE: loop exit
PB: predicated region body
PF: predicated region fallthrough
CT: control target
= control target key end

     0   :  { %12 = vsyncpa [#allocation3], 0  ;;  %s904_s0 = inlined_call_operand.hbm [shape: f32[8,128], index: 0, kind: input, shape index: {}]   ;;  %s905_s1 = inlined_call_operand.hbm [shape: f32[128,256], index: 1, kind: input, shape index: {}]   ;;  %s906_s2 = inlined_call_operand.vmem [shape: f32[1,256], index: 2, kind: input, shape index: {}]   ;;  %s907_s3 = inlined_call_operand.hbm [shape: f32[256,256], index: 3, kind: input, shape index: {}]   ;;  %s908_s4 = inlined_call_operand.vmem [shape: f32[1,256], index: 4, kind: input, shape index: {}]   ;;  %s909_s5 = inlined_call_operand.hbm [shape: f32[256,128], index: 5, kind: input, shape index: {}]   ;;  %s910_s6 = inlined_call_operand.vmem [shape: f32[1,128], index: 6, kind: input, shape index: {}]   ;;  %s911_s7 = inlined_call_operand.hbm [shape: f32[8,128], index: 7, kind: output, shape index: {}]  }
   0x1   :  { %13 = vsyncpa [#allocation6], 0 }
   0x2   :  { %14 = vsyncpa [#allocation9], 0 }
   0x3   :  { %15 = vsyncpa [#allocation4], 0  ;;  %s779_s24 = smov [#allocation5]   ;;  %s661_s28 = scalar_lea.hbm %s905_s1, 4096 }
   0x4   :  { %s31_s25 = sshll.u32 %s779_s24, 4  ;;  %p662_p0 = scmp.ne.s32.totalorder %s905_s1, %s661_s28  ;;  %s32_s25 = int_to_ptr.vmem [resolvable:$true] %s31_s25 }
   0x5   :  { %p665_p1 = scmp.lt.u32.totalorder %s661_s28, %s905_s1 }
   0x7   :  { %p667_p2 = pnand %p665_p1, %p662_p0 }
   0x9   :  { %670 = shalt.err (!%p667_p2)
}
   0xa   :  { %s671_s10 = scalar_lea.vmem %s32_s25, 4096  ;;  %p676_p4 = scmp.lt.s32.totalorder %s32_s25, %s32_s25 }
   0xb   :  { %p672_p3 = scmp.ne.s32.totalorder %s32_s25, %s671_s10  ;;  %p677_p5 = scmp.lt.s32.totalorder %s671_s10, %s671_s10 }
   0xd   :  { %p678_p6 = por %p677_p5, %p676_p4 }
   0xf   :  { %p679_p7 = pnand %p678_p6, %p672_p3 }
  0x11   :  { %682 = shalt.err (!%p679_p7)
}
  0x12   :  { %s780_s11 = smov 256   ;;  %s781_s12 = smov 16  }
  0x13   :  { %37 = dma.hbm_to_vmem [thread:$0]  %s905_s1, 4096, %s32_s25, [#allocation6], %s780_s11, %s780_s11, %s781_s12  }
  0x14   :  { %s782_s15 = smov [#allocation2]   ;;  %s783_s17 = smov [#allocation7]  }
  0x15   :  { %s22_s16 = sshll.u32 %s782_s15, 4  ;;  %s45_s18 = sshll.u32 %s783_s17, 4  ;;  %s23_s16 = int_to_ptr.vmem [resolvable:$true] %s22_s16  ;;  %s46_s18 = int_to_ptr.vmem [resolvable:$true] %s45_s18 }
  0x16   :  { %s683_s21 = scalar_lea.hbm %s904_s0, 128 }
  0x17   :  { %p684_p8 = scmp.ne.s32.totalorder %s904_s0, %s683_s21  ;;  %p687_p9 = scmp.lt.u32.totalorder %s683_s21, %s904_s0 }
  0x19   :  { %p689_p10 = pnand %p687_p9, %p684_p8 }
  0x1b   :  { %692 = shalt.err (!%p689_p10)
}
  0x1c   :  { %s693_s1 = scalar_lea.vmem %s23_s16, 128  ;;  %p698_p12 = scmp.lt.s32.totalorder %s23_s16, %s23_s16 }
  0x1d   :  { %p694_p11 = scmp.ne.s32.totalorder %s23_s16, %s693_s1  ;;  %p699_p13 = scmp.lt.s32.totalorder %s693_s1, %s693_s1 }
  0x1f   :  { %p700_p0 = por %p699_p13, %p698_p12 }
  0x21   :  { %p701_p1 = pnand %p700_p0, %p694_p11 }
  0x23   :  { %704 = shalt.err (!%p701_p1)
}
  0x24   :  { %25 = dma.hbm_to_vmem [thread:$0]  %s904_s0, 128, %s23_s16, [#allocation3]  }
  0x25   :  { %s705_s30 = scalar_lea.hbm %s907_s3, 8192 }
  0x26   :  { %p706_p2 = scmp.ne.s32.totalorder %s907_s3, %s705_s30  ;;  %p709_p3 = scmp.lt.u32.totalorder %s705_s30, %s907_s3 }
  0x28   :  { %p711_p4 = pnand %p709_p3, %p706_p2 }
  0x2a   :  { %714 = shalt.err (!%p711_p4)
}
  0x2b   :  { %s715_s14 = scalar_lea.vmem %s46_s18, 8192  ;;  %p720_p6 = scmp.lt.s32.totalorder %s46_s18, %s46_s18 }
  0x2c   :  { %p716_p5 = scmp.ne.s32.totalorder %s46_s18, %s715_s14  ;;  %p721_p7 = scmp.lt.s32.totalorder %s715_s14, %s715_s14 }
  0x2e   :  { %p722_p8 = por %p721_p7, %p720_p6 }
  0x30   :  { %p723_p9 = pnand %p722_p8, %p716_p5 }
  0x32   :  { %726 = shalt.err (!%p723_p9)
}
  0x33   :  { %51 = dma.hbm_to_vmem [thread:$0]  %s907_s3, 8192, %s46_s18, [#allocation6], %s780_s11, %s780_s11, %s781_s12  }
  0x34   :  { %s784_s16 = smov [#allocation8]   ;;  %s727_s21 = scalar_lea.hbm %s909_s5, 4096 }
  0x35   :  { %s59_s17 = sshll.u32 %s784_s16, 4  ;;  %p728_p10 = scmp.ne.s32.totalorder %s909_s5, %s727_s21  ;;  %s60_s17 = int_to_ptr.vmem [resolvable:$true] %s59_s17 }
  0x36   :  { %p731_p11 = scmp.lt.u32.totalorder %s727_s21, %s909_s5 }
  0x38   :  { %p733_p12 = pnand %p731_p11, %p728_p10 }
  0x3a   :  { %736 = shalt.err (!%p733_p12)
}
  0x3b   :  { %s737_s1 = scalar_lea.vmem %s60_s17, 4096  ;;  %p742_p0 = scmp.lt.s32.totalorder %s60_s17, %s60_s17 }
  0x3c   :  { %p738_p13 = scmp.ne.s32.totalorder %s60_s17, %s737_s1  ;;  %p743_p1 = scmp.lt.s32.totalorder %s737_s1, %s737_s1 }
  0x3e   :  { %p744_p2 = por %p743_p1, %p742_p0 }
  0x40   :  { %p745_p3 = pnand %p744_p2, %p738_p13 }
  0x42   :  { %748 = shalt.err (!%p745_p3)
}
  0x43   :  { %s785_s3 = smov 128   ;;  %s786_s11 = smov 8  }
  0x44   :  { %65 = dma.hbm_to_vmem [thread:$0]  %s909_s5, 4096, %s60_s17, [#allocation9], %s785_s3, %s785_s3, %s786_s11  }
  0x45   :  { %771 = dma.done.wait [#allocation3], 128  }
  0x46   :  { %772 = vsyncadd [#allocation3], 4294967168 }
  0x47   :  { %773 = dma.done.wait [#allocation6], 12288  }
  0x48   :  { %774 = vsyncadd [#allocation6], 4294955008 }
  0x49   :  { %775 = dma.done.wait [#allocation9], 4096  }
  0x4a   :  { %776 = vsyncadd [#allocation9], 4294963200  ;;  %v787_v0 = vmov 0.0   ;;  %v82_v1 = vld [vmem:[#allocation5 + $0x8] sm:$0xff]  ;;  %v84_v2 = vld [vmem:[#allocation5 + $0x18] sm:$0xff] }
  0x4b   :  { %189 = vmatprep.mubr.f32.mxu0 %v787_v0  ;;  %v81_v3 = vld [vmem:[#allocation5] sm:$0xff]  ;;  %v519_v4 = vpack.c.bf16 %v84_v2, %v82_v1  ;;  %v83_v5 = vld [vmem:[#allocation5 + $0x10] sm:$0xff]  ;;  %v86_v6 = vld [vmem:[#allocation5 + $0x28] sm:$0xff] }
  0x4c   :  { %v88_v7 = vld [vmem:[#allocation5 + $0x38] sm:$0xff]  ;;  %v521_v8 = vpack.c.bf16 %v83_v5, %v81_v3  ;;  %v85_v10 = vld [vmem:[#allocation5 + $0x20] sm:$0xff]  ;;  %v87_v11 = vld [vmem:[#allocation5 + $0x30] sm:$0xff] }
  0x4d   :  { %v523_v9 = vpack.c.bf16 %v88_v7, %v86_v6  ;;  %v90_v12 = vld [vmem:[#allocation5 + $0x48] sm:$0xff]  ;;  %520 = vmatprep.subr.bf16.mxu0 %v519_v4  ;;  %v92_v13 = vld [vmem:[#allocation5 + $0x58] sm:$0xff]  ;;  %v525_v14 = vpack.c.bf16 %v87_v11, %v85_v10  ;;  %v89_v16 = vld [vmem:[#allocation5 + $0x40] sm:$0xff] }
  0x4e   :  { %522 = vmatpush1.bf16.msra.mxu0 %v521_v8  ;;  %v527_v15 = vpack.c.bf16 %v92_v13, %v90_v12  ;;  %v91_v17 = vld [vmem:[#allocation5 + $0x50] sm:$0xff]  ;;  %v94_v18 = vld [vmem:[#allocation5 + $0x68] sm:$0xff]  ;;  %v96_v19 = vld [vmem:[#allocation5 + $0x78] sm:$0xff] }
  0x4f   :  { %524 = vmatprep.subr.bf16.mxu0 %v523_v9  ;;  %v529_v20 = vpack.c.bf16 %v91_v17, %v89_v16  ;;  %v531_v21 = vpack.c.bf16 %v96_v19, %v94_v18  ;;  %v93_v22 = vld [vmem:[#allocation5 + $0x60] sm:$0xff]  ;;  %v95_v23 = vld [vmem:[#allocation5 + $0x70] sm:$0xff]  ;;  %v98_v24 = vld [vmem:[#allocation5 + $0x88] sm:$0xff] }
  0x50   :  { %v100_v25 = vld [vmem:[#allocation5 + $0x98] sm:$0xff]  ;;  %v97_v26 = vld [vmem:[#allocation5 + $0x80] sm:$0xff]  ;;  %v99_v27 = vld [vmem:[#allocation5 + $0x90] sm:$0xff]  ;;  %v533_v31 = vpack.c.bf16 %v95_v23, %v93_v22 }
  0x51   :  { %v199_v28 = vld [vmem:[#allocation7 + $0x8] sm:$0xff]  ;;  %v201_v29 = vld [vmem:[#allocation7 + $0x18] sm:$0xff]  ;;  %v198_v30 = vld [vmem:[#allocation7] sm:$0xff]  ;;  %v535_v36 = vpack.c.bf16 %v100_v25, %v98_v24  ;;  %v537_v46 = vpack.c.bf16 %v99_v27, %v97_v26 }
  0x52   :  { %526 = vmatpush1.bf16.msra.mxu0 %v525_v14  ;;  %v551_v32 = vpack.c.bf16 %v201_v29, %v199_v28  ;;  %v200_v33 = vld [vmem:[#allocation7 + $0x10] sm:$0xff]  ;;  %v203_v34 = vld [vmem:[#allocation7 + $0x28] sm:$0xff]  ;;  %v205_v35 = vld [vmem:[#allocation7 + $0x38] sm:$0xff] }
  0x53   :  { %528 = vmatprep.subr.bf16.mxu0 %v527_v15  ;;  %v553_v37 = vpack.c.bf16 %v200_v33, %v198_v30  ;;  %v555_v38 = vpack.c.bf16 %v205_v35, %v203_v34  ;;  %v202_v39 = vld [vmem:[#allocation7 + $0x20] sm:$0xff]  ;;  %v204_v40 = vld [vmem:[#allocation7 + $0x30] sm:$0xff]  ;;  %v207_v41 = vld [vmem:[#allocation7 + $0x48] sm:$0xff] }
  0x54   :  { %v102_v42 = vld [vmem:[#allocation5 + $0xa8] sm:$0xff]  ;;  %v104_v43 = vld [vmem:[#allocation5 + $0xb8] sm:$0xff]  ;;  %552 = vmatprep.subr.bf16.mxu1 %v551_v32  ;;  %v557_v45 = vpack.c.bf16 %v204_v40, %v202_v39  ;;  %v101_v47 = vld [vmem:[#allocation5 + $0xa0] sm:$0xff] }
  0x55   :  { %v209_v44 = vld [vmem:[#allocation7 + $0x58] sm:$0xff]  ;;  %554 = vmatpush1.bf16.msra.mxu1 %v553_v37  ;;  %v206_v49 = vld [vmem:[#allocation7 + $0x40] sm:$0xff]  ;;  %v208_v50 = vld [vmem:[#allocation7 + $0x50] sm:$0xff]  ;;  %v539_v51 = vpack.c.bf16 %v104_v43, %v102_v42 }
  0x56   :  { %530 = vmatpush1.bf16.msra.mxu0 %v529_v20  ;;  %556 = vmatprep.subr.bf16.mxu1 %v555_v38  ;;  %v559_v48 = vpack.c.bf16 %v209_v44, %v207_v41  ;;  %v103_v52 = vld [vmem:[#allocation5 + $0xb0] sm:$0xff]  ;;  %v211_v53 = vld [vmem:[#allocation7 + $0x68] sm:$0xff]  ;;  %v213_v54 = vld [vmem:[#allocation7 + $0x78] sm:$0xff]  ;;  %v561_v57 = vpack.c.bf16 %v208_v50, %v206_v49 }
  0x57   :  { %532 = vmatprep.subr.bf16.mxu0 %v531_v21  ;;  %v106_v55 = vld [vmem:[#allocation5 + $0xc8] sm:$0xff]  ;;  %v108_v56 = vld [vmem:[#allocation5 + $0xd8] sm:$0xff]  ;;  %v541_v58 = vpack.c.bf16 %v103_v52, %v101_v47  ;;  %v105_v59 = vld [vmem:[#allocation5 + $0xc0] sm:$0xff]  ;;  %v563_v60 = vpack.c.bf16 %v213_v54, %v211_v53 }
  0x58   :  { %v210_v61 = vld [vmem:[#allocation7 + $0x60] sm:$0xff]  ;;  %v212_v62 = vld [vmem:[#allocation7 + $0x70] sm:$0xff]  ;;  %v543_v63 = vpack.c.bf16 %v108_v56, %v106_v55  ;;  %v215_v1 = vld [vmem:[#allocation7 + $0x88] sm:$0xff] }
  0x59   :  { %558 = vmatpush1.bf16.msra.mxu1 %v557_v45  ;;  %v107_v0 = vld [vmem:[#allocation5 + $0xd0] sm:$0xff]  ;;  %v217_v2 = vld [vmem:[#allocation7 + $0x98] sm:$0xff]  ;;  %v110_v3 = vld [vmem:[#allocation5 + $0xe8] sm:$0xff]  ;;  %v565_v5 = vpack.c.bf16 %v212_v62, %v210_v61 }
  0x5a   :  { %534 = vmatpush1.bf16.msra.mxu0 %v533_v31  ;;  %560 = vmatprep.subr.bf16.mxu1 %v559_v48  ;;  %v112_v4 = vld [vmem:[#allocation5 + $0xf8] sm:$0xff]  ;;  %v545_v6 = vpack.c.bf16 %v107_v0, %v105_v59  ;;  %v109_v7 = vld [vmem:[#allocation5 + $0xe0] sm:$0xff]  ;;  %v567_v8 = vpack.c.bf16 %v217_v2, %v215_v1  ;;  %v216_v10 = vld [vmem:[#allocation7 + $0x90] sm:$0xff] }
  0x5b   :  { %536 = vmatprep.subr.bf16.mxu0 %v535_v36  ;;  %v214_v9 = vld [vmem:[#allocation7 + $0x80] sm:$0xff]  ;;  %v547_v11 = vpack.c.bf16 %v112_v4, %v110_v3  ;;  %v111_v12 = vld [vmem:[#allocation5 + $0xf0] sm:$0xff]  ;;  %v219_v13 = vld [vmem:[#allocation7 + $0xa8] sm:$0xff] }
  0x5c   :  { %v221_v14 = vld [vmem:[#allocation7 + $0xb8] sm:$0xff]  ;;  %v569_v15 = vpack.c.bf16 %v216_v10, %v214_v9  ;;  %v549_v16 = vpack.c.bf16 %v111_v12, %v109_v7  ;;  %v218_v18 = vld [vmem:[#allocation7 + $0xa0] sm:$0xff]  ;;  %v220_v19 = vld [vmem:[#allocation7 + $0xb0] sm:$0xff] }
  0x5d   :  { %562 = vmatpush1.bf16.msra.mxu1 %v561_v57  ;;  %v571_v17 = vpack.c.bf16 %v221_v14, %v219_v13  ;;  %v223_v20 = vld [vmem:[#allocation7 + $0xc8] sm:$0xff]  ;;  %v225_v21 = vld [vmem:[#allocation7 + $0xd8] sm:$0xff]  ;;  %v573_v22 = vpack.c.bf16 %v220_v19, %v218_v18  ;;  %v222_v25 = vld [vmem:[#allocation7 + $0xc0] sm:$0xff] }
  0x5e   :  { %538 = vmatpush1.bf16.msra.mxu0 %v537_v46  ;;  %564 = vmatprep.subr.bf16.mxu1 %v563_v60  ;;  %v80_v23 = vld [vmem:[#allocation2] sm:$0xff]  ;;  %v575_v24 = vpack.c.bf16 %v225_v21, %v223_v20  ;;  %v224_v26 = vld [vmem:[#allocation7 + $0xd0] sm:$0xff]  ;;  %v227_v27 = vld [vmem:[#allocation7 + $0xe8] sm:$0xff] }
  0x5f   :  { %540 = vmatprep.subr.bf16.mxu0 %v539_v51  ;;  %v229_v28 = vld [vmem:[#allocation7 + $0xf8] sm:$0xff]  ;;  %v577_v29 = vpack.c.bf16 %v224_v26, %v222_v25  ;;  %v226_v31 = vld [vmem:[#allocation7 + $0xe0] sm:$0xff]  ;;  %v228_v32 = vld [vmem:[#allocation7 + $0xf0] sm:$0xff] }
  0x60   :  { %v579_v30 = vpack.c.bf16 %v229_v28, %v227_v27  ;;  %v231_v33 = vld [vmem:[#allocation7 + $0x108] sm:$0xff]  ;;  %v233_v34 = vld [vmem:[#allocation7 + $0x118] sm:$0xff]  ;;  %v581_v35 = vpack.c.bf16 %v228_v32, %v226_v31  ;;  %v230_v37 = vld [vmem:[#allocation7 + $0x100] sm:$0xff] }
  0x61   :  { %566 = vmatpush1.bf16.msra.mxu1 %v565_v5  ;;  %v583_v36 = vpack.c.bf16 %v233_v34, %v231_v33  ;;  %v232_v38 = vld [vmem:[#allocation7 + $0x110] sm:$0xff]  ;;  %v235_v39 = vld [vmem:[#allocation7 + $0x128] sm:$0xff]  ;;  %v237_v40 = vld [vmem:[#allocation7 + $0x138] sm:$0xff] }
  0x62   :  { %542 = vmatpush1.bf16.msra.mxu0 %v541_v58  ;;  %568 = vmatprep.subr.bf16.mxu1 %v567_v8  ;;  %v585_v41 = vpack.c.bf16 %v232_v38, %v230_v37  ;;  %v587_v42 = vpack.c.bf16 %v237_v40, %v235_v39  ;;  %v234_v43 = vld [vmem:[#allocation7 + $0x120] sm:$0xff]  ;;  %v236_v44 = vld [vmem:[#allocation7 + $0x130] sm:$0xff]  ;;  %v239_v45 = vld [vmem:[#allocation7 + $0x148] sm:$0xff] }
  0x63   :  { %544 = vmatprep.subr.bf16.mxu0 %v543_v63  ;;  %v241_v46 = vld [vmem:[#allocation7 + $0x158] sm:$0xff]  ;;  %v589_v47 = vpack.c.bf16 %v236_v44, %v234_v43  ;;  %v238_v49 = vld [vmem:[#allocation7 + $0x140] sm:$0xff]  ;;  %v240_v50 = vld [vmem:[#allocation7 + $0x150] sm:$0xff] }
  0x64   :  { %v591_v48 = vpack.c.bf16 %v241_v46, %v239_v45  ;;  %v243_v51 = vld [vmem:[#allocation7 + $0x168] sm:$0xff]  ;;  %v245_v52 = vld [vmem:[#allocation7 + $0x178] sm:$0xff]  ;;  %v593_v53 = vpack.c.bf16 %v240_v50, %v238_v49  ;;  %v242_v55 = vld [vmem:[#allocation7 + $0x160] sm:$0xff] }
  0x65   :  { %570 = vmatpush1.bf16.msra.mxu1 %v569_v15  ;;  %v595_v54 = vpack.c.bf16 %v245_v52, %v243_v51  ;;  %v244_v56 = vld [vmem:[#allocation7 + $0x170] sm:$0xff]  ;;  %v247_v57 = vld [vmem:[#allocation7 + $0x188] sm:$0xff]  ;;  %v249_v58 = vld [vmem:[#allocation7 + $0x198] sm:$0xff] }
  0x66   :  { %546 = vmatpush1.bf16.msra.mxu0 %v545_v6  ;;  %572 = vmatprep.subr.bf16.mxu1 %v571_v17  ;;  %v597_v59 = vpack.c.bf16 %v244_v56, %v242_v55  ;;  %v599_v60 = vpack.c.bf16 %v249_v58, %v247_v57  ;;  %v246_v61 = vld [vmem:[#allocation7 + $0x180] sm:$0xff]  ;;  %v248_v62 = vld [vmem:[#allocation7 + $0x190] sm:$0xff]  ;;  %v251_v63 = vld [vmem:[#allocation7 + $0x1a8] sm:$0xff]  ;;  %v115_v57 = vlaneseq }
  0x67   :  { %548 = vmatprep.subr.bf16.mxu0 %v547_v11  ;;  %v253_v0 = vld [vmem:[#allocation7 + $0x1b8] sm:$0xff]  ;;  %v601_v1 = vpack.c.bf16 %v248_v62, %v246_v61  ;;  %v250_v3 = vld [vmem:[#allocation7 + $0x1a0] sm:$0xff]  ;;  %v252_v4 = vld [vmem:[#allocation7 + $0x1b0] sm:$0xff] }
  0x68   :  { %v603_v2 = vpack.c.bf16 %v253_v0, %v251_v63  ;;  %v255_v5 = vld [vmem:[#allocation7 + $0x1c8] sm:$0xff]  ;;  %v257_v6 = vld [vmem:[#allocation7 + $0x1d8] sm:$0xff]  ;;  %v605_v7 = vpack.c.bf16 %v252_v4, %v250_v3  ;;  %v254_v9 = vld [vmem:[#allocation7 + $0x1c0] sm:$0xff]  ;;  %v116_v58 = vshrl.u32 %v115_v57, 7 }
  0x69   :  { %574 = vmatpush1.bf16.msra.mxu1 %v573_v22  ;;  %v607_v8 = vpack.c.bf16 %v257_v6, %v255_v5  ;;  %v256_v10 = vld [vmem:[#allocation7 + $0x1d0] sm:$0xff]  ;;  %v259_v12 = vld [vmem:[#allocation7 + $0x1e8] sm:$0xff]  ;;  %v261_v13 = vld [vmem:[#allocation7 + $0x1f8] sm:$0xff] }
  0x6a   :  { %550 = vmatpush1.bf16.msra.mxu0 %v549_v16  ;;  %576 = vmatprep.subr.bf16.mxu1 %v575_v24  ;;  %v609_v11 = vpack.c.bf16 %v256_v10, %v254_v9  ;;  %v611_v14 = vpack.c.bf16 %v261_v13, %v259_v12  ;;  %v258_v15 = vld [vmem:[#allocation7 + $0x1e0] sm:$0xff]  ;;  %v260_v16 = vld [vmem:[#allocation7 + $0x1f0] sm:$0xff]  ;;  %v364_v19 = vld [vmem:[#allocation8 + $0x88] sm:$0xff]  ;;  %v121_v61 = vsub.s32 1, %v116_v58 }
  0x6b   :  { %v613_v17 = vpack.c.bf16 %v260_v16, %v258_v15  ;;  %v363_v18 = vld [vmem:[#allocation8 + $0x80] sm:$0xff]  ;;  %v348_v22 = vld [vmem:[#allocation8 + $0x8] sm:$0xff]  ;;  %v366_v24 = vld [vmem:[#allocation8 + $0x98] sm:$0xff] }
  0x6c   :  { %v347_v20 = vld [vmem:[#allocation8] sm:$0xff]  ;;  %v615_v21 = vpack.c.bf16 %v364_v19, %v363_v18  ;;  %v349_v27 = vld [vmem:[#allocation8 + $0x10] sm:$0xff]  ;;  %v350_v28 = vld [vmem:[#allocation8 + $0x18] sm:$0xff] }
  0x6d   :  { %190 = vmatmul.mubr.f32.vlgmr.msra.gmra.mrb[0].mxu0 %v80_v23  ;;  %578 = vmatpush1.bf16.msra.mxu1 %v577_v29  ;;  %v365_v23 = vld [vmem:[#allocation8 + $0x90] sm:$0xff]  ;;  %v617_v25 = vpack.c.bf16 %v348_v22, %v347_v20  ;;  %v367_v29 = vld [vmem:[#allocation8 + $0xa0] sm:$0xff]  ;;  %v621_v31 = vpack.c.bf16 %v350_v28, %v349_v27  ;;  %v352_v34 = vld [vmem:[#allocation8 + $0x28] sm:$0xff] }
  0x6e   :  { %580 = vmatprep.subr.bf16.mxu1 %v579_v30  ;;  %v619_v26 = vpack.c.bf16 %v366_v24, %v365_v23  ;;  %616 = vmatprep.subr.bf16.mxu0 %v615_v21  ;;  %v368_v30 = vld [vmem:[#allocation8 + $0xa8] sm:$0xff]  ;;  %v351_v33 = vld [vmem:[#allocation8 + $0x20] sm:$0xff]  ;;  %v353_v39 = vld [vmem:[#allocation8 + $0x30] sm:$0xff] }
  0x6f   :  { %618 = vmatpush3.bf16.msra.mxu0 %v617_v25  ;;  %v623_v32 = vpack.c.bf16 %v368_v30, %v367_v29  ;;  %v625_v37 = vpack.c.bf16 %v352_v34, %v351_v33  ;;  %v354_v40 = vld [vmem:[#allocation8 + $0x38] sm:$0xff]  ;;  %v355_v45 = vld [vmem:[#allocation8 + $0x40] sm:$0xff]  ;;  %v356_v46 = vld [vmem:[#allocation8 + $0x48] sm:$0xff] }
  0x70   :  { %620 = vmatprep.subr.bf16.mxu0 %v619_v26  ;;  %v629_v43 = vpack.c.bf16 %v354_v40, %v353_v39  ;;  %v633_v49 = vpack.c.bf16 %v356_v46, %v355_v45  ;;  %v357_v51 = vld [vmem:[#allocation8 + $0x50] sm:$0xff]  ;;  %v358_v52 = vld [vmem:[#allocation8 + $0x58] sm:$0xff]  ;;  %v359_v6 = vld [vmem:[#allocation8 + $0x60] sm:$0xff] }
  0x71   :  { %582 = vmatpush1.bf16.msra.mxu1 %v581_v35  ;;  %v369_v35 = vld [vmem:[#allocation8 + $0xb0] sm:$0xff]  ;;  %v637_v55 = vpack.c.bf16 %v358_v52, %v357_v51  ;;  %v378_v10 = vld [vmem:[#allocation8 + $0xf8] sm:$0xff] }
  0x72   :  { %584 = vmatprep.subr.bf16.mxu1 %v583_v36  ;;  %v370_v36 = vld [vmem:[#allocation8 + $0xb8] sm:$0xff]  ;;  %v377_v9 = vld [vmem:[#allocation8 + $0xf0] sm:$0xff] }
  0x73   :  { %622 = vmatpush3.bf16.msra.mxu0 %v621_v31  ;;  %v627_v38 = vpack.c.bf16 %v370_v36, %v369_v35  ;;  %v361_v12 = vld [vmem:[#allocation8 + $0x70] sm:$0xff]  ;;  %v362_v13 = vld [vmem:[#allocation8 + $0x78] sm:$0xff] }
  0x74   :  { %624 = vmatprep.subr.bf16.mxu0 %v623_v32  ;;  %v262_v15 = vld [vmem:[%s908_s4] sm:$0x3]  ;;  %s788_s4 = smov [#allocation10]  }
  0x75   :  { %586 = vmatpush1.bf16.msra.mxu1 %v585_v41  ;;  %v371_v41 = vld [vmem:[#allocation8 + $0xc0] sm:$0xff]  ;;  %v483_v26 = vld [vmem:[%s910_s6] ss:$0 sm:$0xff]  ;;  %s472_s30 = sshll.u32 %s788_s4, 4  ;;  %s473_s30 = int_to_ptr.vmem [resolvable:$true] %s472_s30 }
  0x76   :  { %588 = vmatprep.subr.bf16.mxu1 %v587_v42  ;;  %v372_v42 = vld [vmem:[#allocation8 + $0xc8] sm:$0xff]  ;;  %s749_s8 = scalar_lea.vmem %s473_s30, 128  ;;  %p754_p5 = scmp.lt.s32.totalorder %s473_s30, %s473_s30 }
  0x77   :  { %626 = vmatpush3.bf16.msra.mxu0 %v625_v37  ;;  %v631_v44 = vpack.c.bf16 %v372_v42, %v371_v41  ;;  %p750_p4 = scmp.ne.s32.totalorder %s473_s30, %s749_s8  ;;  %p755_p6 = scmp.lt.s32.totalorder %s749_s8, %s749_s8 }
  0x78   :  { %628 = vmatprep.subr.bf16.mxu0 %v627_v38 }
  0x79   :  { %590 = vmatpush1.bf16.msra.mxu1 %v589_v47  ;;  %v373_v47 = vld [vmem:[#allocation8 + $0xd0] sm:$0xff]  ;;  %p756_p7 = por %p755_p6, %p754_p5 }
  0x7a   :  { %592 = vmatprep.subr.bf16.mxu1 %v591_v48  ;;  %v374_v48 = vld [vmem:[#allocation8 + $0xd8] sm:$0xff] }
  0x7b   :  { %630 = vmatpush3.bf16.msra.mxu0 %v629_v43  ;;  %v635_v50 = vpack.c.bf16 %v374_v48, %v373_v47  ;;  %p757_p8 = pnand %p756_p7, %p750_p4 }
  0x7c   :  { %632 = vmatprep.subr.bf16.mxu0 %v631_v44 }
  0x7d   :  { %594 = vmatpush1.bf16.msra.mxu1 %v593_v53  ;;  %v375_v53 = vld [vmem:[#allocation8 + $0xe0] sm:$0xff] }
  0x7e   :  { %596 = vmatprep.subr.bf16.mxu1 %v595_v54  ;;  %v376_v54 = vld [vmem:[#allocation8 + $0xe8] sm:$0xff] }
  0x7f   :  { %634 = vmatpush3.bf16.msra.mxu0 %v633_v49  ;;  %v639_v56 = vpack.c.bf16 %v376_v54, %v375_v53 }
  0x80   :  { %636 = vmatprep.subr.bf16.mxu0 %v635_v50 }
  0x81   :  { %598 = vmatpush1.bf16.msra.mxu1 %v597_v59  ;;  %v117_v59 = vsub.s32 0, %v116_v58 }
  0x82   :  { %600 = vmatprep.subr.bf16.mxu1 %v599_v60  ;;  %v113_v60 = vld [vmem:[%s906_s2] sm:$0x3] }
  0x83   :  { %638 = vmatpush3.bf16.msra.mxu0 %v637_v55  ;;  %v118_v62 = vrot.slane %v113_v60, %v117_v59  ;;  %v122_v63 = vrot.slane %v113_v60, %v121_v61  ;;  %v267_v16 = vrot.slane %v262_v15, %v117_v59 }
  0x84   :  { %640 = vmatprep.subr.bf16.mxu0 %v639_v56 }
  0x85   :  { %602 = vmatpush1.bf16.msra.mxu1 %v601_v1 }
  0x86   :  { %604 = vmatprep.subr.bf16.mxu1 %v603_v2 }
  0x89   :  { %606 = vmatpush1.bf16.msra.mxu1 %v605_v7  ;;  %v360_v7 = vld [vmem:[#allocation8 + $0x68] sm:$0xff] }
  0x8a   :  { %608 = vmatprep.subr.bf16.mxu1 %v607_v8  ;;  %v641_v8 = vpack.c.bf16 %v360_v7, %v359_v6 }
  0x8c   :  { %642 = vmatpush3.bf16.msra.mxu0 %v641_v8 }
  0x8d   :  { %610 = vmatpush1.bf16.msra.mxu1 %v609_v11  ;;  %v643_v11 = vpack.c.bf16 %v378_v10, %v377_v9 }
  0x8e   :  { %612 = vmatprep.subr.bf16.mxu1 %v611_v14  ;;  %v645_v14 = vpack.c.bf16 %v362_v13, %v361_v12 }
  0x8f   :  { %644 = vmatprep.subr.bf16.mxu0 %v643_v11 }
  0x90   :  { %646 = vmatpush3.bf16.msra.mxu0 %v645_v14 }
  0x91   :  { %614 = vmatpush1.bf16.msra.mxu1 %v613_v17  ;;  %v271_v17 = vrot.slane %v262_v15, %v121_v61 }
 0x140   :  { %v191_v0 = vpop.f32.mrb[0].mxu0 }
 0x141   :  { %v192_v1 = vadd.f32 %v191_v0, %v118_v62  ;;  %v193_v2 = vpop.f32.mrb[1].mxu0 }
 0x142   :  { %v194_v3 = vadd.f32 %v193_v2, %v122_v63 }
 0x143   :  { %v196_v5 = vmax.f32 %v192_v1, 0.0 }
 0x144   :  { %v197_v4 = vmax.f32 %v194_v3, 0.0 }
 0x146   :  { %338 = vmatprep.mubr.f32.mxu1 %v197_v4 }
 0x147   :  { %339 = vmatmul.mubr.f32.vlgmr.msra.gmra.mrb[0].mxu1 %v196_v5 }
 0x21a   :  { %v340_v18 = vpop.f32.mrb[0].mxu1 }
 0x21b   :  { %v341_v19 = vadd.f32 %v340_v18, %v267_v16  ;;  %v342_v20 = vpop.f32.mrb[1].mxu1 }
 0x21c   :  { %v343_v21 = vadd.f32 %v342_v20, %v271_v17 }
 0x21d   :  { %v345_v23 = vmax.f32 %v341_v19, 0.0 }
 0x21e   :  { %v346_v22 = vmax.f32 %v343_v21, 0.0 }
 0x220   :  { %450 = vmatprep.mubr.f32.mxu0 %v346_v22 }
 0x221   :  { %451 = vmatmul.mubr.f32.vlgmr.msra.gmra.mrb[2].mxu0 %v345_v23 }
 0x2f4   :  { %v516_v24 = vpop.f32.mrb[2].mxu0 }
 0x2f5   :  { %v517_v25 = vpop.f32.mrb[3].mxu0 }
 0x2f6   :  { %v518_v27 = vadd.f32 %v517_v25, %v516_v24 }
 0x2f8   :  { %v453_v28 = vadd.f32 %v518_v27, %v483_v26 }
 0x2fa   :  { %456 = vmax.xlane.f32.xlu0 %v453_v28 }
 0x387   :  { %v457_v29 = vpop.xlane.xlu0 %456 }
 0x388   :  { %v458_v30 = vsub.f32 %v453_v28, %v457_v29 }
 0x38a   :  { %v459_v31 = vmul.f32 1.442695, %v458_v30 }
 0x38c   :  { %657 = vpow2.f32 %v459_v31 }
 0x396   :  { %v658_v32 = vpop.eup %657 }
 0x397   :  { %461 = vadd.xlane.f32.xlu0 %v658_v32 }
 0x424   :  { %v462_v33 = vpop.xlane.xlu0 %461 }
 0x425   :  { %659 = vrcp.f32 %v462_v33 }
 0x42f   :  { %v660_v34 = vpop.eup %659 }
 0x430   :  { %v464_v35 = vmul.f32 %v660_v34, %v658_v32 }
 0x432   :  { %465 = vst [vmem:[#allocation10] sm:$0xff] %v464_v35 }
 0x433   :  { %760 = shalt.err (!%p757_p8)
}
 0x434   :  { %s761_s10 = scalar_lea.hbm %s911_s7, 128 }
 0x435   :  { %p762_p9 = scmp.ne.s32.totalorder %s911_s7, %s761_s10  ;;  %p765_p10 = scmp.lt.u32.totalorder %s761_s10, %s911_s7 }
 0x437   :  { %p767_p11 = pnand %p765_p10, %p762_p9 }
 0x439   :  { %770 = shalt.err (!%p767_p11)
}
 0x43a   :  { %475 = dma.vmem_to_hbm [thread:$0]  %s473_s30, 128, %s911_s7, [#allocation4]  }
 0x43b   :  { %777 = dma.done.wait [#allocation4], 128  }
 0x43c   :  { %778 = vsyncadd [#allocation4], 4294967168 }
 0x43d   :  { %479 = vsyncpa [#allocation3], 1 }
 0x43e   :  { %480 = vsyncpa [#allocation6], 1 }
 0x43f   :  { %481 = vsyncpa [#allocation9], 1 }
 0x440   :  { %482 = vsyncpa [#allocation4], 1 }

</bundles_post_ra>
